<compile_context>
chip_gen: v5e
topology: v5e:2x2
jax: 0.10.0
libtpu: 0.0.40
codegen_flags: <defaults>
</compile_context>

<pallas_src>
import functools

import jax
import jax.numpy as jnp
from jax.experimental import pallas as pl
from jax.experimental.pallas import tpu as pltpu


def _res_unit_up_kernel(x_ref, wf_ref, bias_ref, mask_ref, o_ref, stk_ref,
                        *, H, W, Cin_p):
    # x_ref:    (1, Cin_p, N + 2P)  f32, flat zero halo of width P = W+1 baked in
    # wf_ref:   (Cout, 9*Cin_p)     bf16 fused conv weights, tap-major rows
    # bias_ref: (Cout, N)           f32 fused per-pixel bias map (border-aware)
    # mask_ref: (2, N)              f32 {0,1}: row0 = ok_left, row1 = ok_right
    # o_ref:    (1, Cout, N)        lane-dense output (reshapes to NCHW for free)
    # stk_ref:  (9*Cin_p, N)        f32 scratch holding the 9 stacked taps
    N = H * W
    P = W + 1

    xp = x_ref[0]                       # (Cin_p, N + 2P)
    ok_left = mask_ref[0:1, :]          # (1, N): tap reads column c-1
    ok_right = mask_ref[1:2, :]         # (1, N): tap reads column c+1

    # Build the (9*Cin_p, N) tap stack with direct, sublane-aligned stores.
    for kh in range(3):                 # static unroll: 9 taps
        for kw in range(3):
            t = kh * 3 + kw
            delta = (kh - 1) * W + (kw - 1)
            tap = xp[:, P + delta:P + delta + N]     # lane-only static shift
            if kw == 0:
                tap = tap * ok_left                  # f32 mask multiply
            elif kw == 2:
                tap = tap * ok_right
            stk_ref[t * Cin_p:(t + 1) * Cin_p, :] = tap

    # Single fused MXU matmul, bf16 operands, f32 accumulation.
    y = jnp.dot(wf_ref[...], stk_ref[...].astype(jnp.bfloat16),
                preferred_element_type=jnp.float32)
    o_ref[0] = (y + bias_ref[...]).astype(o_ref.dtype)


@jax.jit
def res_unit_up(x_nchw, w1, b1, w2, b2, w3, b3):
    """x_nchw: (B, Cin, H, W) f32.  Weights in PyTorch Conv2d layouts:
       w1 (Cmid, Cin), b1 (Cmid,), w2 (Cmid, Cmid, 3, 3) OIHW, b2 (Cmid,),
       w3 (Cout, Cmid), b3 (Cout,).  Returns (B, Cout, H, W) f32."""
    B, Cin, H, W = x_nchw.shape
    Cmid = w2.shape[0]
    Cout = w3.shape[0]
    N = H * W
    P = W + 1
    Cin_p = max(8, ((Cin + 7) // 8) * 8)   # sublane-aligned input channels

    # ---- exact algebraic fusion of conv1x1 -> conv3x3 -> conv1x1 ----
    # Wf[o, i, kh, kw] = sum_{m,n} w3[o,m] * w2[m,n,kh,kw] * w1[n,i]
    wf = jnp.einsum("om,mnhw,ni->oihw", w3, w2, w1)               # (Cout, Cin, 3, 3)
    wf = jnp.transpose(wf, (0, 2, 3, 1))                          # (Cout, 3, 3, Cin)
    wf = jnp.pad(wf, ((0, 0), (0, 0), (0, 0), (0, Cin_p - Cin)))  # pad Cin -> Cin_p
    wf = wf.reshape(Cout, 9 * Cin_p).astype(jnp.bfloat16)         # tap-major rows

    # Per-pixel fused bias map (Cout, N).  b1 only reaches taps that land inside
    # the image, so its contribution varies near the border; push a constant-b1
    # feature map through conv2 (zero pad) then conv3 to get it exactly.
    dn = ("NCHW", "OIHW", "NCHW")
    y1b = jnp.broadcast_to(b1[None, :, None, None], (1, Cmid, H, W)).astype(jnp.float32)
    y2b = jax.lax.conv_general_dilated(y1b, w2, (1, 1), ((1, 1), (1, 1)),
                                       dimension_numbers=dn)
    y2b = y2b + b2[None, :, None, None]
    bias_map = jnp.einsum("om,bmhw->bohw", w3, y2b) + b3[None, :, None, None]
    bias_map = bias_map.reshape(Cout, N).astype(jnp.float32)

    # Left/right border masks (1.0 keep, 0.0 where a tap would wrap across rows).
    col = jnp.arange(N, dtype=jnp.int32) % W
    mask_lr = jnp.stack([(col >= 1), (col <= W - 2)], axis=0).astype(jnp.float32)

    # Channels-major activations, channels padded to a sublane multiple, flat zero
    # halo of width P baked into the lane (H*W) axis host-side.
    x = x_nchw.reshape(B, Cin, N).astype(jnp.float32)
    x_p = jnp.pad(x, ((0, 0), (0, Cin_p - Cin), (P, P)))          # (B, Cin_p, N+2P)

    kernel = functools.partial(_res_unit_up_kernel, H=H, W=W, Cin_p=Cin_p)
    flops = 2 * B * N * 9 * Cin_p * Cout
    bytes_accessed = (4 * (B * Cin_p * (N + 2 * P) + B * Cout * N
                           + bias_map.size + mask_lr.size) + 2 * wf.size)

    out = pl.pallas_call(
        kernel,
        out_shape=jax.ShapeDtypeStruct((B, Cout, N), jnp.float32),
        grid_spec=pltpu.PrefetchScalarGridSpec(
            num_scalar_prefetch=0,
            grid=(B,),
            in_specs=[
                pl.BlockSpec((1, Cin_p, N + 2 * P), lambda b: (b, 0, 0)),
                pl.BlockSpec((Cout, 9 * Cin_p), lambda b: (0, 0)),
                pl.BlockSpec((Cout, N), lambda b: (0, 0)),
                pl.BlockSpec((2, N), lambda b: (0, 0)),
            ],
            out_specs=pl.BlockSpec((1, Cout, N), lambda b: (b, 0, 0)),
            scratch_shapes=[pltpu.VMEM((9 * Cin_p, N), jnp.float32)],
        ),
        compiler_params=pltpu.CompilerParams(
            dimension_semantics=("parallel",)),
        cost_estimate=pl.CostEstimate(
            flops=flops, transcendentals=0, bytes_accessed=bytes_accessed),
    )(x_p, wf, bias_map, mask_lr)

    return out.reshape(B, Cout, H, W)   # free reshape back to NCHW


def _ref_forward(x, w1, b1, w2, b2, w3, b3):
    """Pure-JAX f32 reference (NCHW / OIHW, cross-correlation == PyTorch Conv2d)."""
    dn = ("NCHW", "OIHW", "NCHW")
    y = jax.lax.conv_general_dilated(x, w1[:, :, None, None], (1, 1), "VALID",
                                     dimension_numbers=dn)
    y = y + b1[None, :, None, None]
    y = jax.lax.conv_general_dilated(y, w2, (1, 1), ((1, 1), (1, 1)),
                                     dimension_numbers=dn)
    y = y + b2[None, :, None, None]
    y = jax.lax.conv_general_dilated(y, w3[:, :, None, None], (1, 1), "VALID",
                                     dimension_numbers=dn)
    y = y + b3[None, :, None, None]
    return y


if __name__ == "__main__":
    # ResUnitUp(inch=4, outch=8): Cmid = outch // 4 = 2
    B, Cin, H, W = 2, 4, 16, 16
    Cout = 8
    Cmid = Cout // 4

    key = jax.random.PRNGKey(0)
    k = jax.random.split(key, 7)
    x = jax.random.normal(k[0], (B, Cin, H, W), jnp.float32)
    # Parameters in PyTorch Conv2d layouts (1x1 conv weights as 2D matrices).
    w1 = 0.1 * jax.random.normal(k[1], (Cmid, Cin), jnp.float32)
    b1 = 0.1 * jax.random.normal(k[2], (Cmid,), jnp.float32)
    w2 = 0.1 * jax.random.normal(k[3], (Cmid, Cmid, 3, 3), jnp.float32)  # OIHW
    b2 = 0.1 * jax.random.normal(k[4], (Cmid,), jnp.float32)
    w3 = 0.1 * jax.random.normal(k[5], (Cout, Cmid), jnp.float32)
    b3 = 0.1 * jax.random.normal(k[6], (Cout,), jnp.float32)

    out = jax.block_until_ready(res_unit_up(x, w1, b1, w2, b2, w3, b3))
    ref = jax.block_until_ready(_ref_forward(x, w1, b1, w2, b2, w3, b3))

    assert out.shape == (B, Cout, H, W), out.shape
    max_err = float(jnp.max(jnp.abs(out - ref)))
    # bf16 matmul operands with f32 accumulation: expected error ~1e-4 at these scales.
    assert max_err < 2e-3, max_err

    print("KERNEL_OK")
</pallas_src>

<mosaic_0001>
module attributes {stable_mosaic.version = 11 : i64} {
  func.func @_res_unit_up_kernel(%arg0: i32, %arg1: memref<1x8x290xf32, #tpu.memory_space<vmem>>, %arg2: memref<8x72xbf16, #tpu.memory_space<vmem>>, %arg3: memref<8x256xf32, #tpu.memory_space<vmem>>, %arg4: memref<2x256xf32, #tpu.memory_space<vmem>>, %arg5: memref<1x8x256xf32, #tpu.memory_space<vmem>>, %arg6: memref<72x256xf32, #tpu.memory_space<vmem>>) attributes {dimension_semantics = [#tpu.dimension_semantics<parallel>], iteration_bounds = array<i64: 2>, scalar_prefetch = 0 : i64, scratch_operands = 1 : i64, tpu.core_type = #tpu.core_type<tc>, window_params = [{transform_indices = @transform_0, window_bounds = array<i64: 1, 8, 290>}, {pipeline_mode = #tpu.pipeline_mode<synchronous>, transform_indices = @transform_1, window_bounds = array<i64: 8, 72>}, {pipeline_mode = #tpu.pipeline_mode<synchronous>, transform_indices = @transform_2, window_bounds = array<i64: 8, 256>}, {pipeline_mode = #tpu.pipeline_mode<synchronous>, transform_indices = @transform_3, window_bounds = array<i64: 2, 256>}, {transform_indices = @transform_4, window_bounds = array<i64: 1, 8, 256>}]} {
    %c0 = arith.constant 0 : index
    %c0_0 = arith.constant 0 : index
    %c0_1 = arith.constant 0 : index
    %0 = vector.load %arg1[%c0, %c0_0, %c0_1] : memref<1x8x290xf32, #tpu.memory_space<vmem>>, vector<1x8x290xf32>
    %1 = vector.shape_cast %0 : vector<1x8x290xf32> to vector<8x290xf32>
    %c0_2 = arith.constant 0 : index
    %c0_3 = arith.constant 0 : index
    %2 = vector.load %arg4[%c0_2, %c0_3] : memref<2x256xf32, #tpu.memory_space<vmem>>, vector<1x256xf32>
    %c1 = arith.constant 1 : index
    %c0_4 = arith.constant 0 : index
    %3 = vector.load %arg4[%c1, %c0_4] : memref<2x256xf32, #tpu.memory_space<vmem>>, vector<1x256xf32>
    %4 = vector.extract_strided_slice %1 {offsets = [0, 0], sizes = [8, 256], strides = [1, 1]} : vector<8x290xf32> to vector<8x256xf32>
    %5 = vector.broadcast %2 : vector<1x256xf32> to vector<8x256xf32>
    %6 = arith.mulf %4, %5 : vector<8x256xf32>
    %c0_5 = arith.constant 0 : index
    %c0_6 = arith.constant 0 : index
    %7 = vector.load %arg6[%c0_5, %c0_6] : memref<72x256xf32, #tpu.memory_space<vmem>>, vector<8x256xf32>
    tpu.vector_store %arg6[%c0_5, %c0_6], %6 {strides = array<i32>} : memref<72x256xf32, #tpu.memory_space<vmem>>, vector<8x256xf32>,
    %8 = vector.extract_strided_slice %1 {offsets = [0, 1], sizes = [8, 256], strides = [1, 1]} : vector<8x290xf32> to vector<8x256xf32>
    %c8 = arith.constant 8 : index
    %c0_7 = arith.constant 0 : index
    %9 = vector.load %arg6[%c8, %c0_7] : memref<72x256xf32, #tpu.memory_space<vmem>>, vector<8x256xf32>
    tpu.vector_store %arg6[%c8, %c0_7], %8 {strides = array<i32>} : memref<72x256xf32, #tpu.memory_space<vmem>>, vector<8x256xf32>,
    %10 = vector.extract_strided_slice %1 {offsets = [0, 2], sizes = [8, 256], strides = [1, 1]} : vector<8x290xf32> to vector<8x256xf32>
    %11 = vector.broadcast %3 : vector<1x256xf32> to vector<8x256xf32>
    %12 = arith.mulf %10, %11 : vector<8x256xf32>
    %c16 = arith.constant 16 : index
    %c0_8 = arith.constant 0 : index
    %13 = vector.load %arg6[%c16, %c0_8] : memref<72x256xf32, #tpu.memory_space<vmem>>, vector<8x256xf32>
    tpu.vector_store %arg6[%c16, %c0_8], %12 {strides = array<i32>} : memref<72x256xf32, #tpu.memory_space<vmem>>, vector<8x256xf32>,
    %14 = vector.extract_strided_slice %1 {offsets = [0, 16], sizes = [8, 256], strides = [1, 1]} : vector<8x290xf32> to vector<8x256xf32>
    %15 = vector.broadcast %2 : vector<1x256xf32> to vector<8x256xf32>
    %16 = arith.mulf %14, %15 : vector<8x256xf32>
    %c24 = arith.constant 24 : index
    %c0_9 = arith.constant 0 : index
    %17 = vector.load %arg6[%c24, %c0_9] : memref<72x256xf32, #tpu.memory_space<vmem>>, vector<8x256xf32>
    tpu.vector_store %arg6[%c24, %c0_9], %16 {strides = array<i32>} : memref<72x256xf32, #tpu.memory_space<vmem>>, vector<8x256xf32>,
    %18 = vector.extract_strided_slice %1 {offsets = [0, 17], sizes = [8, 256], strides = [1, 1]} : vector<8x290xf32> to vector<8x256xf32>
    %c32 = arith.constant 32 : index
    %c0_10 = arith.constant 0 : index
    %19 = vector.load %arg6[%c32, %c0_10] : memref<72x256xf32, #tpu.memory_space<vmem>>, vector<8x256xf32>
    tpu.vector_store %arg6[%c32, %c0_10], %18 {strides = array<i32>} : memref<72x256xf32, #tpu.memory_space<vmem>>, vector<8x256xf32>,
    %20 = vector.extract_strided_slice %1 {offsets = [0, 18], sizes = [8, 256], strides = [1, 1]} : vector<8x290xf32> to vector<8x256xf32>
    %21 = vector.broadcast %3 : vector<1x256xf32> to vector<8x256xf32>
    %22 = arith.mulf %20, %21 : vector<8x256xf32>
    %c40 = arith.constant 40 : index
    %c0_11 = arith.constant 0 : index
    %23 = vector.load %arg6[%c40, %c0_11] : memref<72x256xf32, #tpu.memory_space<vmem>>, vector<8x256xf32>
    tpu.vector_store %arg6[%c40, %c0_11], %22 {strides = array<i32>} : memref<72x256xf32, #tpu.memory_space<vmem>>, vector<8x256xf32>,
    %24 = vector.extract_strided_slice %1 {offsets = [0, 32], sizes = [8, 256], strides = [1, 1]} : vector<8x290xf32> to vector<8x256xf32>
    %25 = vector.broadcast %2 : vector<1x256xf32> to vector<8x256xf32>
    %26 = arith.mulf %24, %25 : vector<8x256xf32>
    %c48 = arith.constant 48 : index
    %c0_12 = arith.constant 0 : index
    %27 = vector.load %arg6[%c48, %c0_12] : memref<72x256xf32, #tpu.memory_space<vmem>>, vector<8x256xf32>
    tpu.vector_store %arg6[%c48, %c0_12], %26 {strides = array<i32>} : memref<72x256xf32, #tpu.memory_space<vmem>>, vector<8x256xf32>,
    %28 = vector.extract_strided_slice %1 {offsets = [0, 33], sizes = [8, 256], strides = [1, 1]} : vector<8x290xf32> to vector<8x256xf32>
    %c56 = arith.constant 56 : index
    %c0_13 = arith.constant 0 : index
    %29 = vector.load %arg6[%c56, %c0_13] : memref<72x256xf32, #tpu.memory_space<vmem>>, vector<8x256xf32>
    tpu.vector_store %arg6[%c56, %c0_13], %28 {strides = array<i32>} : memref<72x256xf32, #tpu.memory_space<vmem>>, vector<8x256xf32>,
    %30 = vector.extract_strided_slice %1 {offsets = [0, 34], sizes = [8, 256], strides = [1, 1]} : vector<8x290xf32> to vector<8x256xf32>
    %31 = vector.broadcast %3 : vector<1x256xf32> to vector<8x256xf32>
    %32 = arith.mulf %30, %31 : vector<8x256xf32>
    %c64 = arith.constant 64 : index
    %c0_14 = arith.constant 0 : index
    %33 = vector.load %arg6[%c64, %c0_14] : memref<72x256xf32, #tpu.memory_space<vmem>>, vector<8x256xf32>
    tpu.vector_store %arg6[%c64, %c0_14], %32 {strides = array<i32>} : memref<72x256xf32, #tpu.memory_space<vmem>>, vector<8x256xf32>,
    %c0_15 = arith.constant 0 : index
    %c0_16 = arith.constant 0 : index
    %34 = vector.load %arg2[%c0_15, %c0_16] : memref<8x72xbf16, #tpu.memory_space<vmem>>, vector<8x72xbf16>
    %c0_17 = arith.constant 0 : index
    %c0_18 = arith.constant 0 : index
    %35 = vector.load %arg6[%c0_17, %c0_18] : memref<72x256xf32, #tpu.memory_space<vmem>>, vector<72x256xf32>
    %36 = arith.truncf %35 : vector<72x256xf32> to vector<72x256xbf16>
    %cst = arith.constant dense<0.000000e+00> : vector<8x256xf32>
    %37 = tpu.matmul %34, %36, %cst {dimension_numbers = #tpu.dot_dimension_numbers<[1], [0], [0], [1], [0, 0, 1, 1], [], []>} : vector<8x72xbf16>, vector<72x256xbf16>, vector<8x256xf32> -> vector<8x256xf32>
    %c0_19 = arith.constant 0 : index
    %c0_20 = arith.constant 0 : index
    %38 = vector.load %arg3[%c0_19, %c0_20] : memref<8x256xf32, #tpu.memory_space<vmem>>, vector<8x256xf32>
    %39 = arith.addf %37, %38 : vector<8x256xf32>
    %c0_21 = arith.constant 0 : index
    %c0_22 = arith.constant 0 : index
    %c0_23 = arith.constant 0 : index
    %40 = vector.load %arg5[%c0_21, %c0_22, %c0_23] : memref<1x8x256xf32, #tpu.memory_space<vmem>>, vector<1x8x256xf32>
    %41 = vector.shape_cast %40 : vector<1x8x256xf32> to vector<8x256xf32>
    %42 = vector.shape_cast %39 : vector<8x256xf32> to vector<1x8x256xf32>
    tpu.vector_store %arg5[%c0_21, %c0_22, %c0_23], %42 {strides = array<i32>} : memref<1x8x256xf32, #tpu.memory_space<vmem>>, vector<1x8x256xf32>,
    return
  }
  func.func @transform_0(%arg0: i32) -> (i32, i32, i32) {
    %c0_i32 = arith.constant 0 : i32
    %c0_i32_0 = arith.constant 0 : i32
    %c0_i32_1 = arith.constant 0 : i32
    return %arg0, %c0_i32, %c0_i32_0 : i32, i32, i32
  }
  func.func @transform_1(%arg0: i32) -> (i32, i32) {
    %c0_i32 = arith.constant 0 : i32
    %c0_i32_0 = arith.constant 0 : i32
    %c0_i32_1 = arith.constant 0 : i32
    return %c0_i32, %c0_i32_0 : i32, i32
  }
  func.func @transform_2(%arg0: i32) -> (i32, i32) {
    %c0_i32 = arith.constant 0 : i32
    %c0_i32_0 = arith.constant 0 : i32
    %c0_i32_1 = arith.constant 0 : i32
    return %c0_i32, %c0_i32_0 : i32, i32
  }
  func.func @transform_3(%arg0: i32) -> (i32, i32) {
    %c0_i32 = arith.constant 0 : i32
    %c0_i32_0 = arith.constant 0 : i32
    %c0_i32_1 = arith.constant 0 : i32
    return %c0_i32, %c0_i32_0 : i32, i32
  }
  func.func @transform_4(%arg0: i32) -> (i32, i32, i32) {
    %c0_i32 = arith.constant 0 : i32
    %c0_i32_0 = arith.constant 0 : i32
    %c0_i32_1 = arith.constant 0 : i32
    return %arg0, %c0_i32, %c0_i32_0 : i32, i32, i32
  }
}

</mosaic_0001>

<bundles_post_ra>
// kernel: res_unit_up.1
= control target key start
LH: loop header
LB: loop body
LE: loop exit
PB: predicated region body
PF: predicated region fallthrough
CT: control target
= control target key end

     0   :  { %s646_s15 = smov 0   ;;  %s717_s0 = inlined_call_operand.vmem [shape: f32[2,8,290], index: 0, kind: input, shape index: {}]   ;;  %s718_s1 = inlined_call_operand.vmem [shape: bf16[8,72], index: 1, kind: input, shape index: {}]   ;;  %s719_s2 = inlined_call_operand.vmem [shape: f32[8,256], index: 2, kind: input, shape index: {}]   ;;  %s720_s3 = inlined_call_operand.vmem [shape: f32[2,256], index: 3, kind: input, shape index: {}]   ;;  %s721_s4 = inlined_call_operand.vmem [shape: f32[2,8,256], index: 4, kind: output, shape index: {}]  }
   0x1 LB: > { %s524_s16 = sadd.s32 4294967295, %s606_s15   ;;  %p528_p0 = scmp.ge.s32.totalorder %s606_s15, 1  ;;  %s606_s15 = sphi %s646_s15, %s14_s15  }
   0x2   : > { %p162_p1 = scmp.lt.s32.totalorder %s606_s15, 3 }
   0x4   : > { %p163_p2 = pnand %p528_p0, %p162_p1 }
   0x5   : > { %s608_s21 = smov (!%p163_p2), 34   ;;  %s609_s22 = smov (!%p163_p2), 18  }
   0x6   : > { %166 = sbr.rel (%p163_p2) target bundleno = 429 (0x1ad), region = 36  ;;  %s610_s23 = smov (!%p163_p2), 32  }
   0x7   : > { %p188_p3 = scmp.lt.s32.totalorder (!%p163_p2), %s524_s16, 1  ;;  %s611_s28 = smov (!%p163_p2), 2  }
   0x8   : > { %s612_s29 = smov (!%p163_p2), 16   ;;  %s613_s30 = smov (!%p163_p2), 95  }
   0x9   : > { %s614_s5 = smov (!%p163_p2), 111   ;;  %s615_s6 = smov (!%p163_p2), 94  }
   0xa   : > { %s616_s7 = smov (!%p163_p2), 96   ;;  %s617_s8 = smov (!%p163_p2), 126  }
   0xb   : > { %v532_v0 = vld [vmem:[%s720_s3 + $0x1] ss:$2 sm:$0x3]  ;;  %v202_v2 = vld [vmem:[%s720_s3] ss:$2 sm:$0x3] }
   0xc   : > { %v231_v1 = vperm.slane %v532_v0, 0  ;;  %v660_v3 = vperm.slane %v202_v2, 0  ;;  %v232_v4 = vperm.slane %v532_v0, 1  ;;  %v663_v5 = vperm.slane %v202_v2, 1  ;;  %s723_s16 = smov (!%p188_p3, %s524_s16), 1  ;;  %s618_s9 = smov 110  }
   0xd   : > { %s538_s24 = smul.u32 24, %s723_s16  ;;  %vm375_vm0 = vcmask 277504   ;;  %vm237_vm1 = vcmask 15360   ;;  %vm334_vm2 = vcmask 261120   ;;  %vm265_vm3 = vcmask 130048   ;;  %s619_s10 = smov 112  }
   0xe   : > { %371 = vrot.lane.b32.xlu0 %v231_v1, %s608_s21  ;;  %302 = vrot.lane.b32.xlu2 %v231_v1, %s609_s22  ;;  %vm306_vm4 = vcmask 146432   ;;  %s620_s11 = smov 127   ;;  %vm392_vm5 = vcmask 769024   ;;  %vm434_vm6 = vcmask 1043456   ;;  %vm364_vm7 = vcmask 777216   ;;  %s537_s14 = sshll.u32 %s723_s16, 4 }
   0xf   : > { %330 = vrot.lane.b32.xlu1 %v660_v3, %s610_s23  ;;  %s192_s27 = scalar_lea.vmem %s717_s0, %s538_s24  ;;  %vm351_vm8 = vcmask 785408   ;;  %vm295_vm9 = vcmask 908288   ;;  %vm323_vm10 = vcmask 900096   ;;  %vm282_vm11 = vcmask 916480  }
  0x10   : > { %v673_v6 = vld [vmem:[%s192_s27] sm:$0xff]  ;;  %v675_v7 = vld [vmem:[%s192_s27 + $0x8] sm:$0xff]  ;;  %v201_v9 = vld [vmem:[%s192_s27 + $0x10] sm:$0xff]  ;;  %vm254_vm12 = vcmask 1031168   ;;  %vm223_vm13 = vcmask 1039360   ;;  %vm430_vm14 = vcmask 588800  }
  0x11   : > { %v679_v8 = vpack.i.bf16 %v675_v7, %v673_v6 }
  0x16   : > { %373 = vrot.lane.b32.xlu0 %v232_v4, %s608_s21  ;;  %304 = vrot.lane.b32.xlu2 %v232_v4, %s609_s22 }
  0x17   : > { %332 = vrot.lane.b32.xlu1 %v663_v5, %s610_s23  ;;  %s197_s23 = scalar_lea.vmem %s721_s4, %s537_s14 }
  0x1e   : > { %233 = vrot.lane.b32.xlu0 %v231_v1, %s611_s28  ;;  %261 = vrot.lane.b32.xlu2 %v660_v3, %s612_s29 }
  0x1f   : > { %235 = vrot.lane.b32.xlu1 %v232_v4, %s611_s28 }
  0x26   : > { %263 = vrot.lane.b32.xlu0 %v663_v5, %s612_s29  ;;  %561 = vrot.lane.b32.xlu2 %v679_v8, %s613_s30 }
  0x27   : > { %566 = vrot.lane.b32.xlu1 %v679_v8, %s614_s5 }
  0x2e   : > { %293 = vrot.lane.b32.xlu2 %v201_v9, %s614_s5  ;;  %362 = vrot.lane.b32.xlu0 %v201_v9, %s613_s30 }
  0x68   : > { %v303_v12 = vpop.permute.xlu2 %302 }
  0x69   : > { %v311_v41 = vmul.f32 %v303_v12, %v673_v6 }
  0x70   : > { %v305_v19 = vpop.permute.xlu2 %304 }
  0x71   : > { %v313_v33 = vmul.f32 %v305_v19, %v201_v9  ;;  %v307_v37 = vsel %vm306_vm4, %v303_v12, %v305_v19 }
  0x72   : > { %v312_v42 = vmul.f32 %v307_v37, %v675_v7 }
  0x74   : > { %v580_v44 = vpack.i.bf16 %v312_v42, %v311_v41 }
  0x78   : > { %v262_v31 = vpop.permute.xlu2 %261 }
  0x79   : > { %v270_v39 = vmul.f32 %v262_v31, %v673_v6 }
  0x80   : > { %v372_v10 = vpop.permute.xlu0 %371  ;;  %v562_v45 = vpop.permute.xlu2 %561 }
  0x81   : > { %v331_v11 = vpop.permute.xlu1 %330  ;;  %v380_v20 = vmul.f32 %v372_v10, %v673_v6  ;;  %v564_v61 = vunpack.i.h.bf16 %v562_v45  ;;  %v563_v62 = vunpack.i.l.bf16 %v562_v45 }
  0x82   : > { %v339_v32 = vmul.f32 %v331_v11, %v673_v6 }
  0x88   : > { %v374_v13 = vpop.permute.xlu0 %373  ;;  %v294_v48 = vpop.permute.xlu2 %293 }
  0x89   : > { %v382_v14 = vmul.f32 %v374_v13, %v201_v9  ;;  %v333_v15 = vpop.permute.xlu1 %332  ;;  %v376_v17 = vsel %vm375_vm0, %v372_v10, %v374_v13 }
  0x8a   : > { %v341_v16 = vmul.f32 %v333_v15, %v201_v9  ;;  %v381_v18 = vmul.f32 %v376_v17, %v675_v7  ;;  %v335_v27 = vsel %vm334_vm2, %v331_v11, %v333_v15 }
  0x8b   : > { %390 = vrot.lane.b32.xlu2 %v382_v14, %s615_s6  ;;  %v340_v30 = vmul.f32 %v335_v27, %v675_v7 }
  0x8c   : > { %349 = vrot.lane.b32.xlu1 %v341_v16, %s616_s7  ;;  %v570_v26 = vpack.i.bf16 %v381_v18, %v380_v20 }
  0x8d   : > { %v575_v36 = vpack.i.bf16 %v340_v30, %v339_v32 }
  0x90   : > { %v234_v21 = vpop.permute.xlu0 %233 }
  0x91   : > { %v242_v22 = vmul.f32 %v234_v21, %v673_v6  ;;  %v236_v23 = vpop.permute.xlu1 %235 }
  0x92   : > { %v238_v24 = vsel %vm237_vm1, %v234_v21, %v236_v23  ;;  %v244_v25 = vmul.f32 %v236_v23, %v201_v9 }
  0x93   : > { %v243_v28 = vmul.f32 %v238_v24, %v675_v7 }
  0x94   : > { %252 = vrot.lane.b32.xlu0 %v244_v25, %s617_s8  ;;  %571 = vrot.lane.b32.xlu1 %v570_v26, %s615_s6 }
  0x95   : > { %v585_v29 = vpack.i.bf16 %v243_v28, %v242_v22 }
  0x97   : > { %586 = vrot.lane.b32.xlu2 %v585_v29, %s617_s8 }
  0x98   : > { %v264_v34 = vpop.permute.xlu0 %263 }
  0x99   : > { %v266_v35 = vsel %vm265_vm3, %v262_v31, %v264_v34  ;;  %v272_v38 = vmul.f32 %v264_v34, %v201_v9  ;;  %v567_v46 = vpop.permute.xlu1 %566 }
  0x9a   : > { %v271_v40 = vmul.f32 %v266_v35, %v675_v7  ;;  %v569_v14 = vunpack.i.h.bf16 %v567_v46  ;;  %v568_v15 = vunpack.i.l.bf16 %v567_v46 }
  0x9c   : > { %321 = vrot.lane.b32.xlu1 %v313_v33, %s618_s9  ;;  %576 = vrot.lane.b32.xlu0 %v575_v36, %s616_s7  ;;  %v590_v43 = vpack.i.bf16 %v271_v40, %v270_v39  ;;  %v296_v22 = vsel %vm295_vm9, %v568_v15, %v569_v14  ;;  %v297_v23 = vsel %vm295_vm9, %v569_v14, %v294_v48 }
  0x9d   : > { %v210_v39 = vmul.f32 %v660_v3, %v673_v6  ;;  %v211_v40 = vmul.f32 %v663_v5, %v675_v7  ;;  %v428_v3 = vld [vmem:[%s719_s2] sm:$0xff]  ;;  %v429_v5 = vld [vmem:[%s719_s2 + $0x8] sm:$0xff] }
  0x9f   : > { %280 = vrot.lane.b32.xlu2 %v272_v38, %s619_s10 }
  0xa0   : > { %v363_v47 = vpop.permute.xlu0 %362 }
  0xa1   : > { %v366_v4 = vsel %vm364_vm7, %v564_v61, %v363_v47  ;;  %v399_v47 = vld [vmem:[%s718_s1] sm:$0xf] }
  0xa4   : > { %581 = vrot.lane.b32.xlu0 %v580_v44, %s618_s9  ;;  %591 = vrot.lane.b32.xlu1 %v590_v43, %s619_s10 }
  0xac   : > { %596 = vrot.lane.b32.xlu0 %v679_v8, %s620_s11  ;;  %221 = vrot.lane.b32.xlu1 %v201_v9, %s620_s11  ;;  %v365_v9 = vsel %vm364_vm7, %v563_v62, %v564_v61 }
  0xe5   : > { %v391_v54 = vpop.permute.xlu2 %390 }
  0xf1   : > { %v587_v11 = vpop.permute.xlu2 %586 }
  0xf2   : > { %v589_v24 = vunpack.i.h.bf16 %v587_v11  ;;  %v588_v25 = vunpack.i.l.bf16 %v587_v11 }
  0xf4   : > { %v255_v34 = vsel %vm254_vm12, %v588_v25, %v589_v24 }
  0xf9   : > { %v281_v28 = vpop.permute.xlu2 %280 }
  0xfe   : > { %v350_v49 = vpop.permute.xlu1 %349 }
 0x106   : > { %v253_v50 = vpop.permute.xlu0 %252  ;;  %v572_v51 = vpop.permute.xlu1 %571 }
 0x107   : > { %v574_v52 = vunpack.i.h.bf16 %v572_v51  ;;  %v573_v53 = vunpack.i.l.bf16 %v572_v51  ;;  %v256_v33 = vsel %vm254_vm12, %v589_v24, %v253_v50 }
 0x109   : > { %v393_v55 = vsel %vm392_vm5, %v573_v53, %v574_v52  ;;  %v394_v56 = vsel %vm392_vm5, %v574_v52, %v391_v54 }
 0x10a   : > { %v426_v57 = vpack.c.bf16 %v393_v55, %v393_v55  ;;  %v427_v58 = vpack.c.bf16 %v394_v56, %v394_v56 }
 0x10c   : > { %v436_v59 = vsel %vm434_vm6, %v426_v57, 0  ;;  %v439_v60 = vsel %vm434_vm6, %v427_v58, 0 }
 0x10d   : > { %444 = vmatpush.bf16.msra.mxu0 %v436_v59  ;;  %457 = vmatpush.bf16.msra.mxu1 %v439_v60 }
 0x10e   : > { %v322_v63 = vpop.permute.xlu1 %321  ;;  %v577_v0 = vpop.permute.xlu0 %576 }
 0x10f   : > { %v579_v1 = vunpack.i.h.bf16 %v577_v0  ;;  %v578_v2 = vunpack.i.l.bf16 %v577_v0 }
 0x111   : > { %v352_v8 = vsel %vm351_vm8, %v578_v2, %v579_v1  ;;  %v353_v10 = vsel %vm351_vm8, %v579_v1, %v350_v49 }
 0x112   : > { %v424_v12 = vpack.c.bf16 %v365_v9, %v352_v8  ;;  %v425_v13 = vpack.c.bf16 %v366_v4, %v353_v10 }
 0x114   : > { %445 = vmatpush.bf16.msra.mxu0 %v424_v12  ;;  %458 = vmatpush.bf16.msra.mxu1 %v425_v13 }
 0x116   : > { %v582_v16 = vpop.permute.xlu0 %581  ;;  %v592_v17 = vpop.permute.xlu1 %591 }
 0x117   : > { %v584_v18 = vunpack.i.h.bf16 %v582_v16  ;;  %v583_v19 = vunpack.i.l.bf16 %v582_v16  ;;  %v594_v20 = vunpack.i.h.bf16 %v592_v17  ;;  %v593_v21 = vunpack.i.l.bf16 %v592_v17 }
 0x119   : > { %v324_v26 = vsel %vm323_vm10, %v583_v19, %v584_v18  ;;  %v325_v27 = vsel %vm323_vm10, %v584_v18, %v322_v63  ;;  %v283_v31 = vsel %vm282_vm11, %v593_v21, %v594_v20  ;;  %v284_v32 = vsel %vm282_vm11, %v594_v20, %v281_v28 }
 0x11a   : > { %v422_v29 = vpack.c.bf16 %v324_v26, %v296_v22  ;;  %v423_v30 = vpack.c.bf16 %v325_v27, %v297_v23  ;;  %v420_v37 = vpack.c.bf16 %v283_v31, %v255_v34  ;;  %v421_v38 = vpack.c.bf16 %v284_v32, %v256_v33 }
 0x11c   : > { %446 = vmatpush.bf16.msra.mxu0 %v422_v29  ;;  %459 = vmatpush.bf16.msra.mxu1 %v423_v30 }
 0x11e   : > { %v597_v35 = vpop.permute.xlu0 %596  ;;  %v222_v36 = vpop.permute.xlu1 %221 }
 0x11f   : > { %v599_v41 = vunpack.i.h.bf16 %v597_v35  ;;  %v598_v42 = vunpack.i.l.bf16 %v597_v35 }
 0x120   : > { %447 = vmatpush.bf16.msra.mxu0 %v420_v37  ;;  %460 = vmatpush.bf16.msra.mxu1 %v421_v38 }
 0x121   : > { %v225_v43 = vsel %vm223_vm13, %v599_v41, %v222_v36  ;;  %v224_v44 = vsel %vm223_vm13, %v598_v42, %v599_v41 }
 0x122   : > { %v418_v45 = vpack.c.bf16 %v224_v44, %v210_v39  ;;  %v419_v46 = vpack.c.bf16 %v225_v43, %v211_v40 }
 0x124   : > { %448 = vmatpush.bf16.msra.mxu0 %v418_v45  ;;  %461 = vmatpush.bf16.msra.mxu1 %v419_v46 }
 0x127   : > { %533 = vmatmul.msk.bf16.vlgmr.msra.gmra.mxu0 %vm430_vm14, %v399_v47  ;;  %534 = vmatmul.msk.bf16.vlgmr.msra.gmra.mxu1 %vm430_vm14, %v399_v47 }
 0x1a4   : > { %v450_v6 = vpop.f32.mrf.mxu0  ;;  %v463_v7 = vpop.f32.mrf.mxu1 }
 0x1a5   : > { %v451_v48 = vadd.f32 %v450_v6, %v428_v3  ;;  %v464_v49 = vadd.f32 %v463_v7, %v429_v5 }
 0x1a7   : > { %467 = vst [vmem:[%s197_s23] sm:$0xff] %v451_v48 }
 0x1a8   : > { %468 = vst [vmem:[%s197_s23 + $0x8] sm:$0xff] %v464_v49 }
 0x1ac   : > { %v452_v50 = vpop.f32.mrf.mxu0  ;;  %v465_v51 = vpop.f32.mrf.mxu1 }
 0x1ad PF: > { %s14_s15 = sadd.s32 1, %s606_s15  }
 0x1ae   : > { %p11_p4 = scmp.ge.s32.totalorder %s14_s15, 4  }
 0x1b0   :  { %13 = sbr.rel (!%p11_p4) target bundleno = 1 (0x1), region = 67 }

</bundles_post_ra>
